<compile_context>
chip_gen: v5e
topology: v5e:2x2
jax: 0.10.0
libtpu: 0.0.40
codegen_flags: <defaults>
</compile_context>

<pallas_src>
import jax
import jax.numpy as jnp
from jax import lax
from jax.experimental import pallas as pl
from jax.experimental.pallas import tpu as pltpu


def _round_up(x, m):
    return ((x + m - 1) // m) * m


def _cdiv(a, b):
    return -(-a // b)


def _tile_and_pad(dim, granule, cap):
    """Return (tile, padded_dim).

    Small dims use a single granule-padded tile; large dims are split into
    equal granule-aligned tiles and the dim is padded up to a multiple of the
    tile.  Padding waste is bounded by < one granule per tile -- we never
    shrink to tiny 128-/8-wide tiles for non-power-of-two sizes.
    """
    padded = _round_up(dim, granule)
    if padded <= cap:
        return padded, padded
    n_tiles = _cdiv(padded, cap)
    tile = _round_up(_cdiv(padded, n_tiles), granule)
    return tile, tile * n_tiles


_V7X_SAFE_BUDGET = 48 * 1024 * 1024  # leaves headroom under v7x's 64 MiB VMEM


def _vmem_budget_bytes():
    """~75% of physical VMEM, clamped to [32, 100] MiB; v7x-safe fallback."""
    try:
        cap = getattr(pltpu.get_tpu_info(), "vmem_capacity_bytes", None)
    except Exception:
        cap = None
    if not cap:
        return _V7X_SAFE_BUDGET
    return max(32 * 1024 * 1024, min(int(cap) * 3 // 4, 100 * 1024 * 1024))


def _linear_kernel_acc(x_ref, w_ref, b_ref, o_ref, acc_ref):
    # grid = (M, N, K) with K innermost.
    # x_ref  : [tm, tk]   activation tile
    # w_ref  : [tn, tk]   weight tile in native PyTorch [D_out, D_in] layout
    # b_ref  : [1,  tn]   bias tile (f32)
    # o_ref  : [tm, tn]   output tile
    # acc_ref: [tm, tn]   f32 accumulator, persists across the K axis
    k = pl.program_id(2)

    @pl.when(k == 0)
    def _():
        acc_ref[...] = jnp.zeros_like(acc_ref)

    # Contract x's last axis against W's last axis (== x @ W^T) directly on the
    # MXU; no transposed copy of W is ever materialized.
    acc_ref[...] += lax.dot_general(
        x_ref[...], w_ref[...],
        dimension_numbers=(((1,), (1,)), ((), ())),
        preferred_element_type=jnp.float32,
    )

    @pl.when(k == pl.num_programs(2) - 1)
    def _():
        o_ref[...] = (acc_ref[...] + b_ref[...]).astype(o_ref.dtype)


def _linear_kernel_single_k(x_ref, w_ref, b_ref, o_ref):
    # Fast path: whole K fits in one tile -> no scratch accumulator needed.
    acc = lax.dot_general(
        x_ref[...], w_ref[...],
        dimension_numbers=(((1,), (1,)), ((), ())),
        preferred_element_type=jnp.float32,
    )
    o_ref[...] = (acc + b_ref[...]).astype(o_ref.dtype)


def classifier_forward(x, weight, bias, dropout_p=0.0, out_dtype=None,
                       tile_caps=None):
    """Forward pass of Classifier (dropout(p=0) == identity, then Linear).

    x:      [B, D_in]
    weight: [D_out, D_in]   PyTorch nn.Linear layout (NOT transposed).
            For bandwidth-bound layers on v5e/v6e/v7x, store/cast the weight to
            bf16 ONCE at parameter-store time and pass it here; the wrapper
            never casts W on the hot path.
    bias:   [D_out]
    tile_caps: optional (tm_cap, tn_cap, tk_cap) override (tests / tuning).
    """
    # Dropout with p=0 (module default) / eval mode is the identity.
    # TODO(synk): training-mode dropout (p > 0) would draw a Bernoulli mask via
    # pltpu.prng_seed / pltpu.prng_random_bits and scale by 1/(1-p).
    assert dropout_p == 0.0, "only the default dropout=0 (identity) is implemented"

    B, D_in = x.shape
    D_out, D_in_w = weight.shape
    assert D_in == D_in_w
    if out_dtype is None:
        out_dtype = x.dtype

    # MXU wants matching operand dtypes; cast the (small) activation to the
    # weight's storage dtype.  W itself is never cast here.
    if x.dtype != weight.dtype:
        x = x.astype(weight.dtype)

    in_itemsize = jnp.dtype(weight.dtype).itemsize
    out_itemsize = jnp.dtype(out_dtype).itemsize

    budget = _vmem_budget_bytes()
    big_vmem = budget >= 80 * 1024 * 1024          # 128 MiB parts (v5e/v6e)
    if tile_caps is not None:
        tm_cap, tn_cap, tk_cap = tile_caps
    else:
        tm_cap = 1024                              # whole batch in one M tile
        tn_cap = 1024 if big_vmem else 512
        tk_cap = 4096 if big_vmem else 2048

    # Pick tiles; shrink caps (K, then N, then M) if the double-buffered
    # working set would not fit the budget.  With the default caps this never
    # triggers; it is a safety net for overrides / exotic dtypes.
    for _ in range(16):
        tm, B_p = _tile_and_pad(B, 8, tm_cap)
        tn, N_p = _tile_and_pad(D_out, 128, tn_cap)
        tk, K_p = _tile_and_pad(D_in, 128, tk_cap)
        working_set = (2 * tm * tk * in_itemsize        # x  (double-buffered)
                       + 2 * tn * tk * in_itemsize      # W  (double-buffered)
                       + 2 * tn * 4                     # bias
                       + 2 * tm * tn * out_itemsize     # out
                       + tm * tn * 4)                   # f32 accumulator
        if working_set <= budget:
            break
        if tk > 512:
            tk_cap = max(512, tk // 2)
        elif tn > 256:
            tn_cap = max(256, tn // 2)
        elif tm > 256:
            tm_cap = max(256, tm // 2)
        else:
            break

    m_tiles, n_tiles, k_tiles = B_p // tm, N_p // tn, K_p // tk

    # NOTE: for production, pad (and bf16-cast) the weight once at
    # parameter-store time so this jnp.pad (a full HBM read+write of W) never
    # sits on the per-call hot path.  It is skipped when already aligned.
    x_p = x if (B_p == B and K_p == D_in) else jnp.pad(
        x, ((0, B_p - B), (0, K_p - D_in)))
    w_p = weight if (N_p == D_out and K_p == D_in) else jnp.pad(
        weight, ((0, N_p - D_out), (0, K_p - D_in)))
    b_f32 = bias.astype(jnp.float32)
    b_p = (b_f32 if N_p == D_out else jnp.pad(b_f32, (0, N_p - D_out)))
    b_p = b_p.reshape(1, N_p)

    # Accurate traffic estimate: W is streamed once per M tile, x once per N
    # tile (grid (M, N, K) with K innermost, outputs resident across K).
    w_itemsize = jnp.dtype(w_p.dtype).itemsize
    cost = pl.CostEstimate(
        flops=2 * B_p * K_p * N_p,
        transcendentals=0,
        bytes_accessed=(m_tiles * N_p * K_p * w_itemsize
                        + n_tiles * B_p * K_p * in_itemsize
                        + m_tiles * N_p * 4
                        + B_p * N_p * out_itemsize),
    )

    # Splitting M across TensorCores duplicates W streaming (each core would
    # read all of W); when both M and N are tiled, steer the megacore split
    # onto N by marking M "arbitrary".
    m_sem = "parallel" if (m_tiles == 1 or n_tiles == 1) else "arbitrary"

    if k_tiles == 1:
        kernel = _linear_kernel_single_k
        grid = (m_tiles, n_tiles)
        in_specs = [
            pl.BlockSpec((tm, tk), lambda i, j: (i, 0)),   # x
            pl.BlockSpec((tn, tk), lambda i, j: (j, 0)),   # W (native layout)
            pl.BlockSpec((1, tn), lambda i, j: (0, j)),    # bias
        ]
        out_specs = pl.BlockSpec((tm, tn), lambda i, j: (i, j))
        scratch_shapes = []
        dim_sems = (m_sem, "parallel")
    else:
        kernel = _linear_kernel_acc
        grid = (m_tiles, n_tiles, k_tiles)
        in_specs = [
            pl.BlockSpec((tm, tk), lambda i, j, k: (i, k)),  # x
            pl.BlockSpec((tn, tk), lambda i, j, k: (j, k)),  # W (native layout)
            pl.BlockSpec((1, tn), lambda i, j, k: (0, j)),   # bias
        ]
        out_specs = pl.BlockSpec((tm, tn), lambda i, j, k: (i, j))
        scratch_shapes = [pltpu.VMEM((tm, tn), jnp.float32)]
        dim_sems = (m_sem, "parallel", "arbitrary")

    out = pl.pallas_call(
        kernel,
        out_shape=jax.ShapeDtypeStruct((B_p, N_p), out_dtype),
        grid_spec=pltpu.PrefetchScalarGridSpec(
            num_scalar_prefetch=0,
            grid=grid,
            in_specs=in_specs,
            out_specs=out_specs,
            scratch_shapes=scratch_shapes,
        ),
        compiler_params=pltpu.CompilerParams(
            dimension_semantics=dim_sems,
            vmem_limit_bytes=budget,
        ),
        cost_estimate=cost,
    )(x_p, w_p, b_p)

    if B_p != B or N_p != D_out:
        out = out[:B, :D_out]
    return out


if __name__ == "__main__":
    key = jax.random.PRNGKey(0)
    kx, kw, kb, kx2, kw2, kb2, kx3, kw3, kb3 = jax.random.split(key, 9)

    # ---- Small shape (module-scale demo; exercises lane-dense padding) ----
    B, D_in, D_out = 8, 32, 16
    x = jax.random.normal(kx, (B, D_in), dtype=jnp.float32)
    bound = 1.0 / jnp.sqrt(jnp.float32(D_in))
    weight = jax.random.uniform(kw, (D_out, D_in), jnp.float32, -bound, bound)
    bias = jax.random.uniform(kb, (D_out,), jnp.float32, -bound, bound)

    out = jax.block_until_ready(classifier_forward(x, weight, bias))
    ref = x @ weight.T + bias
    assert out.shape == (B, D_out)
    assert jnp.allclose(out, ref, atol=1e-5, rtol=1e-5), "small f32 mismatch"

    # ---- Awkward sizes + forced multi-tile grid (exercises M/N/K tiling,
    # ---- K accumulation, bias finalize, ragged-batch padding) ----
    B2, D_in2, D_out2 = 200, 640, 384
    x2 = jax.random.normal(kx2, (B2, D_in2), dtype=jnp.float32)
    bound2 = 1.0 / jnp.sqrt(jnp.float32(D_in2))
    weight2 = jax.random.uniform(kw2, (D_out2, D_in2), jnp.float32, -bound2, bound2)
    bias2 = jax.random.uniform(kb2, (D_out2,), jnp.float32, -bound2, bound2)
    ref2 = x2 @ weight2.T + bias2

    out2 = jax.block_until_ready(
        classifier_forward(x2, weight2, bias2, tile_caps=(128, 256, 256)))
    assert out2.shape == (B2, D_out2)
    assert jnp.allclose(out2, ref2, atol=1e-4, rtol=1e-4), "tiled f32 mismatch"

    # ---- bf16 weight-streaming path (recommended on v5e/v6e/v7x).  The weight
    # ---- is cast ONCE here, standing in for a parameter-store-time cast; the
    # ---- wrapper itself never casts W on the hot path. ----
    B3, D_in3, D_out3 = 128, 640, 384
    x3 = jax.random.normal(kx3, (B3, D_in3), dtype=jnp.float32)
    bound3 = 1.0 / jnp.sqrt(jnp.float32(D_in3))
    weight3 = jax.random.uniform(kw3, (D_out3, D_in3), jnp.float32, -bound3, bound3)
    bias3 = jax.random.uniform(kb3, (D_out3,), jnp.float32, -bound3, bound3)
    ref3 = x3 @ weight3.T + bias3

    weight3_bf16 = weight3.astype(jnp.bfloat16)      # hoisted, one-time cast
    out3 = jax.block_until_ready(
        classifier_forward(x3, weight3_bf16, bias3, out_dtype=jnp.float32))
    assert out3.shape == (B3, D_out3)
    assert jnp.allclose(out3, ref3, atol=5e-2, rtol=5e-2), "bf16 mismatch"

    print("KERNEL_OK")
</pallas_src>

<mosaic_0001>
module attributes {stable_mosaic.version = 11 : i64} {
  func.func @_linear_kernel_single_k(%arg0: i32, %arg1: i32, %arg2: memref<8x128xf32, #tpu.memory_space<vmem>>, %arg3: memref<128x128xf32, #tpu.memory_space<vmem>>, %arg4: memref<1x128xf32, #tpu.memory_space<vmem>>, %arg5: memref<8x128xf32, #tpu.memory_space<vmem>>) attributes {dimension_semantics = [#tpu.dimension_semantics<parallel>, #tpu.dimension_semantics<parallel>], iteration_bounds = array<i64: 1, 1>, scalar_prefetch = 0 : i64, scratch_operands = 0 : i64, tpu.core_type = #tpu.core_type<tc>, window_params = [{transform_indices = @transform_0, window_bounds = array<i64: 8, 128>}, {transform_indices = @transform_1, window_bounds = array<i64: 128, 128>}, {transform_indices = @transform_2, window_bounds = array<i64: 1, 128>}, {transform_indices = @transform_3, window_bounds = array<i64: 8, 128>}]} {
    %c0 = arith.constant 0 : index
    %c0_0 = arith.constant 0 : index
    %0 = vector.load %arg2[%c0, %c0_0] : memref<8x128xf32, #tpu.memory_space<vmem>>, vector<8x128xf32>
    %c0_1 = arith.constant 0 : index
    %c0_2 = arith.constant 0 : index
    %1 = vector.load %arg3[%c0_1, %c0_2] : memref<128x128xf32, #tpu.memory_space<vmem>>, vector<128x128xf32>
    %cst = arith.constant dense<0.000000e+00> : vector<8x128xf32>
    %2 = tpu.matmul %0, %1, %cst {dimension_numbers = #tpu.dot_dimension_numbers<[1], [1], [0], [0], [0, 0, 1, 0], [], []>} : vector<8x128xf32>, vector<128x128xf32>, vector<8x128xf32> -> vector<8x128xf32>
    %c0_3 = arith.constant 0 : index
    %c0_4 = arith.constant 0 : index
    %3 = vector.load %arg4[%c0_3, %c0_4] : memref<1x128xf32, #tpu.memory_space<vmem>>, vector<1x128xf32>
    %4 = vector.broadcast %3 : vector<1x128xf32> to vector<8x128xf32>
    %5 = arith.addf %2, %4 : vector<8x128xf32>
    %c0_5 = arith.constant 0 : index
    %c0_6 = arith.constant 0 : index
    %6 = vector.load %arg5[%c0_5, %c0_6] : memref<8x128xf32, #tpu.memory_space<vmem>>, vector<8x128xf32>
    tpu.vector_store %arg5[%c0_5, %c0_6], %5 {strides = array<i32>} : memref<8x128xf32, #tpu.memory_space<vmem>>, vector<8x128xf32>,
    return
  }
  func.func @transform_0(%arg0: i32, %arg1: i32) -> (i32, i32) {
    %c0_i32 = arith.constant 0 : i32
    %c0_i32_0 = arith.constant 0 : i32
    return %arg0, %c0_i32 : i32, i32
  }
  func.func @transform_1(%arg0: i32, %arg1: i32) -> (i32, i32) {
    %c0_i32 = arith.constant 0 : i32
    %c0_i32_0 = arith.constant 0 : i32
    return %arg1, %c0_i32 : i32, i32
  }
  func.func @transform_2(%arg0: i32, %arg1: i32) -> (i32, i32) {
    %c0_i32 = arith.constant 0 : i32
    %c0_i32_0 = arith.constant 0 : i32
    return %c0_i32, %arg1 : i32, i32
  }
  func.func @transform_3(%arg0: i32, %arg1: i32) -> (i32, i32) {
    %c0_i32 = arith.constant 0 : i32
    return %arg0, %arg1 : i32, i32
  }
}

</mosaic_0001>

<bundles_post_ra>
// kernel: tpu_custom_call.1
= control target key start
LH: loop header
LB: loop body
LE: loop exit
PB: predicated region body
PF: predicated region fallthrough
CT: control target
= control target key end

     0   :  { %8 = vsyncpa [#allocation3], 0  ;;  %s226_s0 = inlined_call_operand.hbm [shape: f32[8,128], index: 0, kind: input, shape index: {}]   ;;  %s227_s1 = inlined_call_operand.hbm [shape: f32[128,128], index: 1, kind: input, shape index: {}]   ;;  %s228_s2 = inlined_call_operand.vmem [shape: f32[1,128], index: 2, kind: input, shape index: {}]   ;;  %s229_s3 = inlined_call_operand.hbm [shape: f32[8,128], index: 3, kind: output, shape index: {}]  }
   0x1   :  { %9 = vsyncpa [#allocation6], 0 }
   0x2   :  { %10 = vsyncpa [#allocation4], 0  ;;  %s16_s14 = sshll.u32 %s226_s0, 4  ;;  %s189_s15 = smov [#allocation2]   ;;  %s17_s14 = int_to_ptr.hbm [resolvable:$true] %s16_s14 }
   0x3   :  { %s18_s16 = sshll.u32 %s189_s15, 4  ;;  %s26_s19 = sshll.u32 %s227_s1, 4  ;;  %s19_s16 = int_to_ptr.vmem [resolvable:$true] %s18_s16  ;;  %s27_s19 = int_to_ptr.hbm [resolvable:$true] %s26_s19 }
   0x4   :  { %21 = dma.hbm_to_vmem [thread:$0]  %s17_s14, 128, %s19_s16, [#allocation3]  }
   0x5   :  { %s190_s20 = smov [#allocation5]   ;;  %s191_s22 = smov 128  }
   0x6   :  { %s28_s21 = sshll.u32 %s190_s20, 4  ;;  %s192_s23 = smov 8   ;;  %s29_s21 = int_to_ptr.vmem [resolvable:$true] %s28_s21 }
   0x7   :  { %34 = dma.hbm_to_vmem [thread:$0]  %s27_s19, 2048, %s29_s21, [#allocation6], %s191_s22, %s191_s22, %s192_s23  }
   0x8   :  { %183 = dma.done.wait [#allocation3], 128  }
   0x9   :  { %184 = vsyncadd [#allocation3], 4294967168 }
   0xa   :  { %185 = dma.done.wait [#allocation6], 2048  }
   0xb   :  { %186 = vsyncadd [#allocation6], 4294965248  ;;  %v61_v0 = vld [vmem:[#allocation5 + $0x78] sm:$0xff]  ;;  %v60_v1 = vld [vmem:[#allocation5 + $0x70] sm:$0xff]  ;;  %s193_s24 = smov [#allocation7]   ;;  %s94_s28 = sshll.u32 %s229_s3, 4  ;;  %s95_s28 = int_to_ptr.hbm [resolvable:$true] %s94_s28 }
   0xc   :  { %66 = vmatpush.xpose.msra.mxu0 %v61_v0  ;;  %v59_v2 = vld [vmem:[#allocation5 + $0x68] sm:$0xff]  ;;  %v58_v3 = vld [vmem:[#allocation5 + $0x60] sm:$0xff]  ;;  %v57_v4 = vld [vmem:[#allocation5 + $0x58] sm:$0xff]  ;;  %s92_s25 = sshll.u32 %s193_s24, 4  ;;  %s93_s25 = int_to_ptr.vmem [resolvable:$true] %s92_s25 }
   0xd   :  { %v56_v5 = vld [vmem:[#allocation5 + $0x50] sm:$0xff]  ;;  %v55_v6 = vld [vmem:[#allocation5 + $0x48] sm:$0xff]  ;;  %v54_v7 = vld [vmem:[#allocation5 + $0x40] sm:$0xff] }
   0xe   :  { %v53_v8 = vld [vmem:[#allocation5 + $0x38] sm:$0xff]  ;;  %v52_v9 = vld [vmem:[#allocation5 + $0x30] sm:$0xff]  ;;  %v51_v10 = vld [vmem:[#allocation5 + $0x28] sm:$0xff] }
   0xf   :  { %v50_v11 = vld [vmem:[#allocation5 + $0x20] sm:$0xff]  ;;  %v49_v12 = vld [vmem:[#allocation5 + $0x18] sm:$0xff]  ;;  %v48_v13 = vld [vmem:[#allocation5 + $0x10] sm:$0xff] }
  0x10   :  { %67 = vmatpush.xpose.msra.mxu0 %v60_v1  ;;  %v47_v14 = vld [vmem:[#allocation5 + $0x8] sm:$0xff]  ;;  %v46_v15 = vld [vmem:[#allocation5] sm:$0xff]  ;;  %v45_v16 = vld [vmem:[#allocation2] sm:$0xff] }
  0x11   :  { %v110_v17 = vld [vmem:[%s228_s2] ss:$0 sm:$0xff] }
  0x14   :  { %68 = vmatpush.xpose.msra.mxu0 %v59_v2 }
  0x18   :  { %69 = vmatpush.xpose.msra.mxu0 %v58_v3 }
  0x1c   :  { %70 = vmatpush.xpose.msra.mxu0 %v57_v4 }
  0x20   :  { %71 = vmatpush.xpose.msra.mxu0 %v56_v5 }
  0x24   :  { %72 = vmatpush.xpose.msra.mxu0 %v55_v6 }
  0x28   :  { %73 = vmatpush.xpose.msra.mxu0 %v54_v7 }
  0x2c   :  { %74 = vmatpush.xpose.msra.mxu0 %v53_v8 }
  0x30   :  { %75 = vmatpush.xpose.msra.mxu0 %v52_v9 }
  0x34   :  { %76 = vmatpush.xpose.msra.mxu0 %v51_v10 }
  0x38   :  { %77 = vmatpush.xpose.msra.mxu0 %v50_v11 }
  0x3c   :  { %78 = vmatpush.xpose.msra.mxu0 %v49_v12 }
  0x40   :  { %79 = vmatpush.xpose.msra.mxu0 %v48_v13 }
  0x44   :  { %80 = vmatpush.xpose.msra.mxu0 %v47_v14 }
  0x48   :  { %81 = vmatpush.xpose.msra.mxu0 %v46_v15 }
  0x4b   :  { %82 = vmatmul.f32.vlgmr.msra.gmra.mxu0 %v45_v16 }
  0xc8   :  { %v83_v18 = vpop.f32.mrf.mxu0 }
  0xc9   :  { %v84_v19 = vadd.f32 %v110_v17, %v83_v18 }
  0xcb   :  { %86 = vst [vmem:[#allocation7] sm:$0xff] %v84_v19 }
  0xcc   :  { %97 = dma.vmem_to_hbm [thread:$0]  %s93_s25, 128, %s95_s28, [#allocation4]  }
  0xcd   :  { %187 = dma.done.wait [#allocation4], 128  }
  0xce   :  { %188 = vsyncadd [#allocation4], 4294967168 }
  0xcf   :  { %102 = vsyncpa [#allocation3], 1 }
  0xd0   :  { %103 = vsyncpa [#allocation6], 1 }
  0xd1   :  { %104 = vsyncpa [#allocation4], 1 }

</bundles_post_ra>
